<compile_context>
chip_gen: v7x
topology: tpu7x:2x2x1
jax: 0.10.0
libtpu: 0.0.40
codegen_flags: <defaults>
</compile_context>

<pallas_src>
import jax
import jax.numpy as jnp
from jax.experimental import pallas as pl
from jax.experimental.pallas import tpu as pltpu


# ---------------------------------------------------------------------------
# Generation-aware VMEM budgeting
# ---------------------------------------------------------------------------

def _vmem_params():
    """Returns (tile_budget_bytes, vmem_limit_bytes) derived from the chip."""
    cap = 64 * 1024 * 1024  # conservative fallback = v7x-class (64 MiB / TC)
    try:
        info = pltpu.get_tpu_info()
        c = getattr(info, "vmem_capacity_bytes", None)
        if c:
            cap = int(c)
    except Exception:
        pass
    # Leave ~16 MiB headroom for Mosaic internal scratch / semaphores.
    vmem_limit = max(32 * 1024 * 1024, cap - 16 * 1024 * 1024)
    # Tile-selection budget: ~24 MiB on 64 MiB parts (v7x), ~56 MiB on the
    # 128 MiB parts (v5e/v6e) so streamed blocks get close to the HBM roofline.
    tile_budget = 24 * 1024 * 1024 if cap <= 64 * 1024 * 1024 else 56 * 1024 * 1024
    return tile_budget, vmem_limit


# ---------------------------------------------------------------------------
# Path A: one-hot MXU gather (streams all of x once)
# ---------------------------------------------------------------------------

def _onehot_gather_kernel(idx_ref, x_ref, o_ref):
    # idx_ref: (TB, Kf) int32 -- token indices (into the full x row) to keep
    # x_ref:   (TB, N, TD)    -- all tokens for these batch rows, D-tile TD
    # o_ref:   (TB, Kf, TD)   -- gathered (kept) tokens
    idx = idx_ref[...]
    tb, kf = idx.shape
    n = x_ref.shape[1]

    # One-hot selection matrix in the input dtype (0/1 are exact in bf16).
    col = jax.lax.broadcasted_iota(jnp.int32, (tb, kf, n), 2)       # (TB,Kf,N)
    onehot = (idx[:, :, None] == col).astype(x_ref.dtype)           # (TB,Kf,N)

    xblk = x_ref[...]                                               # (TB,N,TD)
    if xblk.dtype == jnp.float32:
        # Exact multi-pass MXU path so the "gather" copies values bit-exactly.
        acc_dtype, prec = jnp.float32, jax.lax.Precision.HIGHEST
    else:
        # bf16 (etc.): one non-zero term per output element -> exact in bf16,
        # halves the MXU result-pop traffic vs an f32 accumulator.
        acc_dtype, prec = o_ref.dtype, None
    gathered = jnp.einsum("bkn,bnd->bkd", onehot, xblk,
                          preferred_element_type=acc_dtype, precision=prec)
    o_ref[...] = gathered.astype(o_ref.dtype)


def _choose_tiles(B, N, Kf, D, itemsize, budget_bytes):
    """Pick (TB, TD): batch-tile and feature-tile sizes that fit VMEM."""

    def fits(tb, td):
        x_blk = tb * N * td * itemsize        # streamed input block
        o_blk = tb * Kf * td * itemsize       # output block
        idx_blk = tb * Kf * 4
        onehot = tb * Kf * N * (itemsize + 4)  # selection matrix + int temps
        return 2 * (x_blk + o_blk + idx_blk) + onehot <= budget_bytes

    td_cands = [D]
    if D % 128 == 0:
        td_cands += [d for d in (4096, 2048, 1024, 512, 256, 128)
                     if d < D and D % d == 0]

    # TB must be a multiple of 8 or equal to B so the (TB, Kf) index block
    # satisfies the (8,128) sublane rule (Kf == full dim covers the lane axis).
    tb_cands = [t for t in range(B, 0, -1)
                if B % t == 0 and (t == B or t % 8 == 0)]
    if not tb_cands:
        tb_cands = [B]

    best = None
    for tb in tb_cands:
        for td in td_cands:
            if not fits(tb, td):
                continue
            # Prefer >= 2 total grid steps (both v7x TCs get work), achieved by
            # shrinking TD before TB; then prefer the biggest streamed block.
            multi_step = (B // tb) * (D // td) >= 2
            score = (multi_step, tb * N * td)
            if best is None or score > best[0]:
                best = (score, (tb, td))
    if best is not None:
        return best[1]
    return tb_cands[-1], td_cands[-1]


def _onehot_gather(x, keep_idx, tile_budget, vmem_limit):
    B, N, D = x.shape
    Kf = keep_idx.shape[1]
    itemsize = jnp.dtype(x.dtype).itemsize
    TB, TD = _choose_tiles(B, N, Kf, D, itemsize, tile_budget)
    grid = (B // TB, D // TD)

    return pl.pallas_call(
        _onehot_gather_kernel,
        out_shape=jax.ShapeDtypeStruct((B, Kf, D), x.dtype),
        grid_spec=pltpu.PrefetchScalarGridSpec(
            num_scalar_prefetch=0,
            grid=grid,
            in_specs=[
                pl.BlockSpec((TB, Kf), lambda b, d: (b, 0)),
                pl.BlockSpec((TB, N, TD), lambda b, d: (b, 0, d)),
            ],
            out_specs=pl.BlockSpec((TB, Kf, TD), lambda b, d: (b, 0, d)),
        ),
        compiler_params=pltpu.CompilerParams(
            dimension_semantics=("parallel", "parallel"),
            vmem_limit_bytes=vmem_limit),
    )(keep_idx, x)


# ---------------------------------------------------------------------------
# Path B: manual-DMA row gather (reads only the kept rows from HBM)
# ---------------------------------------------------------------------------

_N_DMA_BUFFERS = 8  # in-flight row copies per grid step


def _dma_gather_kernel(idx_ref, x_hbm, o_ref, buf, sems):
    # idx_ref: SMEM (B, Kf) int32, flat row indices into x_hbm's first axis
    # x_hbm:   (B*N, D) HBM ref (memory_space=ANY), never fully streamed
    # o_ref:   (Kf, D) VMEM output block for batch row b (batch dim squeezed)
    # buf:     (NBUF, 1, D) VMEM landing buffers
    # sems:    (NBUF,) DMA semaphores
    b = pl.program_id(0)
    kf = o_ref.shape[0]
    nbuf = buf.shape[0]

    def start_copy(k, slot):
        row = idx_ref[b, k]
        pltpu.make_async_copy(
            x_hbm.at[pl.ds(row, 1)], buf.at[slot], sems.at[slot]).start()

    def wait_copy(slot):
        # Placeholder src slice of identical shape; only size/sem matter here.
        pltpu.make_async_copy(
            x_hbm.at[pl.ds(0, 1)], buf.at[slot], sems.at[slot]).wait()

    # Prime the pipeline with the first min(NBUF, Kf) row fetches.
    @pl.loop(0, min(nbuf, kf))
    def _(k):
        start_copy(k, k)

    # Rotate through the buffer slots: wait, write out, refill from k + NBUF.
    @pl.loop(0, kf)
    def _(k):
        slot = k % nbuf
        wait_copy(slot)
        o_ref[pl.ds(k, 1), :] = buf[slot]
        nxt = k + nbuf

        @pl.when(nxt < kf)
        def _():
            start_copy(nxt, slot)


def _dma_gather(x, keep_idx, vmem_limit):
    B, N, D = x.shape
    Kf = keep_idx.shape[1]
    x_flat = x.reshape(B * N, D)                      # free row-major reshape
    flat_idx = (keep_idx.astype(jnp.int32)
                + (jnp.arange(B, dtype=jnp.int32) * N)[:, None])  # (B, Kf)

    return pl.pallas_call(
        _dma_gather_kernel,
        out_shape=jax.ShapeDtypeStruct((B, Kf, D), x.dtype),
        grid_spec=pltpu.PrefetchScalarGridSpec(
            num_scalar_prefetch=1,                    # flat_idx -> SMEM
            grid=(B,),
            in_specs=[pl.BlockSpec(memory_space=pl.ANY)],
            out_specs=pl.BlockSpec((None, Kf, D), lambda b, idx: (b, 0, 0)),
            scratch_shapes=[
                pltpu.VMEM((_N_DMA_BUFFERS, 1, D), x.dtype),
                pltpu.SemaphoreType.DMA((_N_DMA_BUFFERS,)),
            ]),
        compiler_params=pltpu.CompilerParams(
            dimension_semantics=("parallel",),
            vmem_limit_bytes=vmem_limit),
    )(flat_idx, x_flat)


# ---------------------------------------------------------------------------
# Dispatcher + PatchDropout forward
# ---------------------------------------------------------------------------

def _pallas_gather(x, keep_idx, impl="auto"):
    """x: (B, N, D); keep_idx: (B, Kf) int32 -> out[b, k] = x[b, keep_idx[b, k]]."""
    B, N, D = x.shape
    Kf = keep_idx.shape[1]
    itemsize = jnp.dtype(x.dtype).itemsize
    tile_budget, vmem_limit = _vmem_params()

    if impl == "auto":
        row_bytes = D * itemsize
        keeps_most = Kf * 4 > 3 * N   # keeping >75% of rows: streaming is ~free
        impl = "onehot" if (row_bytes < 2048 or keeps_most) else "dma"

    if impl == "dma":
        return _dma_gather(x, keep_idx, vmem_limit)
    return _onehot_gather(x, keep_idx, tile_budget, vmem_limit)


def patch_dropout(x, key, prob, exclude_first_token=True, gather_impl="auto"):
    """JAX/Pallas equivalent of PatchDropout.forward.

    x: (B, N_tokens, D). Returns (B, 1 + K, D) if exclude_first_token else
    (B, K, D), where K = max(1, int(num_patch_tokens * (1 - prob))).
    """
    assert 0 <= prob < 1.0
    B, N_tok, D = x.shape
    n_patch = N_tok - 1 if exclude_first_token else N_tok

    keep_prob = 1.0 - prob
    num_keep = max(1, int(n_patch * keep_prob))

    # rand = torch.randn(batch, num_tokens); topk along last dim -> kept indices
    rand = jax.random.normal(key, (B, n_patch), dtype=jnp.float32)
    _, patch_indices_keep = jax.lax.top_k(rand, num_keep)            # (B, K)
    patch_indices_keep = patch_indices_keep.astype(jnp.int32)

    if exclude_first_token:
        # Fold CLS handling into the gather: row 0 of the full x is the CLS
        # token, patch index i refers to row i + 1 of the full x.
        idx_full = jnp.concatenate(
            [jnp.zeros((B, 1), jnp.int32), patch_indices_keep + 1], axis=1)
    else:
        idx_full = patch_indices_keep

    return _pallas_gather(x, idx_full, impl=gather_impl)


# ---------------------------------------------------------------------------
# Self-test
# ---------------------------------------------------------------------------

if __name__ == "__main__":
    key = jax.random.PRNGKey(0)
    k_x, k_drop, k_x2 = jax.random.split(key, 3)

    PROB = 0.5

    # ---- Test 1: one-hot MXU path, f32, small shape (1 cls + 16 patches) ----
    B, N_TOKENS, D = 2, 17, 128
    x = jax.random.normal(k_x, (B, N_TOKENS, D), dtype=jnp.float32)
    out = jax.block_until_ready(
        patch_dropout(x, k_drop, prob=PROB, exclude_first_token=True,
                      gather_impl="onehot"))

    rand = jax.random.normal(k_drop, (B, N_TOKENS - 1), dtype=jnp.float32)
    K = max(1, int((N_TOKENS - 1) * (1.0 - PROB)))
    _, idx = jax.lax.top_k(rand, K)
    ref = jnp.concatenate(
        [x[:, :1], jnp.take_along_axis(x[:, 1:], idx[:, :, None], axis=1)], axis=1)
    assert out.shape == (B, 1 + K, D), out.shape
    assert jnp.allclose(out, ref, atol=1e-5), "mismatch vs reference (onehot f32)"

    # ---- Test 2: one-hot path, bf16 (bf16 accumulation is exact here) ----
    x_bf16 = x.astype(jnp.bfloat16)
    out_bf16 = jax.block_until_ready(
        patch_dropout(x_bf16, k_drop, prob=PROB, exclude_first_token=True,
                      gather_impl="onehot"))
    ref_bf16 = jnp.concatenate(
        [x_bf16[:, :1],
         jnp.take_along_axis(x_bf16[:, 1:], idx[:, :, None], axis=1)], axis=1)
    assert out_bf16.dtype == jnp.bfloat16
    assert jnp.allclose(out_bf16.astype(jnp.float32),
                        ref_bf16.astype(jnp.float32)), "mismatch (onehot bf16)"

    # ---- Test 3: DMA row-gather path, f32, 2 KiB rows (1 cls + 32 patches) ----
    B2, N2, D2 = 2, 33, 512
    x2 = jax.random.normal(k_x2, (B2, N2, D2), dtype=jnp.float32)
    out2 = jax.block_until_ready(
        patch_dropout(x2, k_drop, prob=PROB, exclude_first_token=True,
                      gather_impl="dma"))

    rand2 = jax.random.normal(k_drop, (B2, N2 - 1), dtype=jnp.float32)
    K2 = max(1, int((N2 - 1) * (1.0 - PROB)))
    _, idx2 = jax.lax.top_k(rand2, K2)
    ref2 = jnp.concatenate(
        [x2[:, :1],
         jnp.take_along_axis(x2[:, 1:], idx2[:, :, None], axis=1)], axis=1)
    assert out2.shape == (B2, 1 + K2, D2), out2.shape
    assert jnp.allclose(out2, ref2), "mismatch vs reference (dma f32)"

    # ---- Test 4: auto path selection (picks the DMA path for 2 KiB rows) ----
    out_auto = jax.block_until_ready(
        patch_dropout(x2, k_drop, prob=PROB, exclude_first_token=True))
    assert jnp.allclose(out_auto, ref2), "mismatch vs reference (auto)"

    print("KERNEL_OK")
</pallas_src>

<mosaic_0001>
module attributes {stable_mosaic.version = 11 : i64} {
  func.func @_onehot_gather_kernel(%arg0: i32, %arg1: i32, %arg2: memref<2x9xi32, #tpu.memory_space<vmem>>, %arg3: memref<2x17x128xf32, #tpu.memory_space<vmem>>, %arg4: memref<2x9x128xf32, #tpu.memory_space<vmem>>) attributes {dimension_semantics = [#tpu.dimension_semantics<parallel>, #tpu.dimension_semantics<parallel>], iteration_bounds = array<i64: 1, 1>, scalar_prefetch = 0 : i64, scratch_operands = 0 : i64, tpu.core_type = #tpu.core_type<tc>, window_params = [{transform_indices = @transform_0, window_bounds = array<i64: 2, 9>}, {transform_indices = @transform_1, window_bounds = array<i64: 2, 17, 128>}, {transform_indices = @transform_2, window_bounds = array<i64: 2, 9, 128>}]} {
    %c0 = arith.constant 0 : index
    %c0_0 = arith.constant 0 : index
    %0 = vector.load %arg2[%c0, %c0_0] : memref<2x9xi32, #tpu.memory_space<vmem>>, vector<2x9xi32>
    %1 = tpu.iota {dimensions = array<i32: 2>} : vector<2x9x17xi32>
    %2 = vector.shape_cast %0 : vector<2x9xi32> to vector<2x9x1xi32>
    %3 = vector.broadcast %2 : vector<2x9x1xi32> to vector<2x9x17xi32>
    %4 = arith.cmpi eq, %3, %1 : vector<2x9x17xi32>
    %5 = arith.extui %4 : vector<2x9x17xi1> to vector<2x9x17xi32>
    %6 = arith.sitofp %5 : vector<2x9x17xi32> to vector<2x9x17xf32>
    %c0_1 = arith.constant 0 : index
    %c0_2 = arith.constant 0 : index
    %c0_3 = arith.constant 0 : index
    %7 = vector.load %arg3[%c0_1, %c0_2, %c0_3] : memref<2x17x128xf32, #tpu.memory_space<vmem>>, vector<2x17x128xf32>
    "tpu.trace_start"() <{level = 10 : i32, message = "bkn,bnd->bkd"}> : () -> ()
    %cst = arith.constant dense<0.000000e+00> : vector<2x9x128xf32>
    %8 = tpu.matmul %6, %7, %cst {dimension_numbers = #tpu.dot_dimension_numbers<[2], [1], [1], [2], [0, 0, 0, 1, 1, 2], [0], [0]>, precision = #tpu.contract_precision<fp32>} : vector<2x9x17xf32>, vector<2x17x128xf32>, vector<2x9x128xf32> -> vector<2x9x128xf32>
    "tpu.trace_stop"() : () -> ()
    %c0_4 = arith.constant 0 : index
    %c0_5 = arith.constant 0 : index
    %c0_6 = arith.constant 0 : index
    %9 = vector.load %arg4[%c0_4, %c0_5, %c0_6] : memref<2x9x128xf32, #tpu.memory_space<vmem>>, vector<2x9x128xf32>
    tpu.vector_store %arg4[%c0_4, %c0_5, %c0_6], %8 {strides = array<i32>} : memref<2x9x128xf32, #tpu.memory_space<vmem>>, vector<2x9x128xf32>,
    return
  }
  func.func @transform_0(%arg0: i32, %arg1: i32) -> (i32, i32) {
    %c0_i32 = arith.constant 0 : i32
    %c0_i32_0 = arith.constant 0 : i32
    return %arg0, %c0_i32 : i32, i32
  }
  func.func @transform_1(%arg0: i32, %arg1: i32) -> (i32, i32, i32) {
    %c0_i32 = arith.constant 0 : i32
    %c0_i32_0 = arith.constant 0 : i32
    return %arg0, %c0_i32, %arg1 : i32, i32, i32
  }
  func.func @transform_2(%arg0: i32, %arg1: i32) -> (i32, i32, i32) {
    %c0_i32 = arith.constant 0 : i32
    %c0_i32_0 = arith.constant 0 : i32
    return %arg0, %c0_i32, %arg1 : i32, i32, i32
  }
}

</mosaic_0001>

<bundles_post_ra>
// kernel: tpu_custom_call.1
= control target key start
LH: loop header
LB: loop body
LE: loop exit
PB: predicated region body
PF: predicated region fallthrough
CT: control target
= control target key end

     0   :  { %v12_v0 = vlaneseq  ;;  %vm61_vm0 = vcmask 1040384   ;;  %vm54_vm1 = vcmask 138240   ;;  %v1365_v49 = vmov 0.0   ;;  %s1517_s0 = inlined_call_operand.vmem [shape: s32[2,9], index: 0, kind: input, shape index: {}]   ;;  %s1518_s1 = inlined_call_operand.vmem [shape: f32[2,17,128], index: 1, kind: input, shape index: {}]   ;;  %s1519_s2 = inlined_call_operand.vmem [shape: f32[2,9,128], index: 2, kind: output, shape index: {}]  }
   0x1   :  { %v48_v1 = vld [vmem:[%s1518_s1] sm:$0xff]  ;;  %v49_v2 = vld [vmem:[%s1518_s1 + $0x8] sm:$0xff]  ;;  %v51_v6 = vld [vmem:[%s1518_s1 + $0x18] sm:$0xff] }
   0x2   :  { %v15_v3 = vshrl.u32 %v12_v0, 7  ;;  %v66_v4 = vand.u32 4294901760, %v48_v1  ;;  %v69_v5 = vand.u32 4294901760, %v49_v2  ;;  %v52_v7 = vld [vmem:[%s1518_s1 + $0x20] sm:$0xff]  ;;  %v590_v9 = vand.u32 4294901760, %v51_v6 }
   0x3   :  { %v11_v8 = vld [vmem:[%s1517_s0] sm:$0x3]  ;;  %v593_v10 = vand.u32 4294901760, %v52_v7  ;;  %v50_v11 = vld [vmem:[%s1518_s1 + $0x10] sm:$0x1]  ;;  %v13_v45 = vand.u32 127, %v12_v0 }
   0x4   :  { %v16_v12 = vsub.s32 0, %v15_v3  ;;  %v27_v13 = vsub.s32 1, %v15_v3  ;;  %v1399_v14 = vpack.c.bf16 %v69_v5, %v66_v4  ;;  %v63_v15 = vsel %vm61_vm0, %v50_v11, 0  ;;  %v53_v18 = vld [vmem:[%s1518_s1 + $0x28] sm:$0x1] }
   0x5   :  { %v1402_v16 = vpack.c.bf16 %v593_v10, %v590_v9  ;;  %v1404_v17 = vand.u32 4294901760, %v63_v15  ;;  %v155_v19 = vsub.f32 %v48_v1, %v66_v4  ;;  %v162_v20 = vsub.f32 %v49_v2, %v69_v5 }
   0x6   :  { %v17_v21 = vrot.slane %v11_v8, %v16_v12  ;;  %1297 = vmatprep.subr.bf16.mxu0 %v1399_v14  ;;  %v587_v22 = vsel %vm61_vm0, %v53_v18, 0  ;;  %v679_v23 = vsub.f32 %v51_v6, %v590_v9  ;;  %v686_v27 = vsub.f32 %v52_v7, %v593_v10 }
   0x7   :  { %1299 = vmatpush3.bf16.msra.mxu0 %v1399_v14  ;;  %1321 = vmatprep.subr.bf16.mxu1 %v1402_v16  ;;  %v1413_v24 = vand.u32 4294901760, %v587_v22  ;;  %v156_v25 = vand.u32 4294901760, %v155_v19  ;;  %v163_v26 = vand.u32 4294901760, %v162_v20  ;;  %v28_v28 = vrot.slane %v11_v8, %v27_v13 }
   0x8   :  { %23 = vbcast.lane.b32.xlu1 %v17_v21, 264  ;;  %19 = vbcast.lane.b32.xlu0 %v17_v21, 256  ;;  %v680_v29 = vand.u32 4294901760, %v679_v23  ;;  %v687_v32 = vand.u32 4294901760, %v686_v27  ;;  %v1304_v41 = vpack.c.bf16 %v162_v20, %v155_v19  ;;  %v1420_v42 = vpack.c.bf16 %v686_v27, %v679_v23 }
   0x9   :  { %1192 = vmatprep.subr.mxu0 %v1404_v17  ;;  %1323 = vmatpush3.bf16.msra.mxu1 %v1402_v16  ;;  %v157_v30 = vsub.f32 %v155_v19, %v156_v25  ;;  %v164_v31 = vsub.f32 %v162_v20, %v163_v26  ;;  %v1422_v43 = vpack.c.bf16 %v163_v26, %v156_v25 }
   0xa   :  { %1246 = vmatprep.subr.mxu1 %v1413_v24  ;;  %v681_v33 = vsub.f32 %v679_v23, %v680_v29  ;;  %v688_v36 = vsub.f32 %v686_v27, %v687_v32  ;;  %v1424_v44 = vpack.c.bf16 %v687_v32, %v680_v29  ;;  %v169_v46 = vsub.f32 %v63_v15, %v1404_v17 }
   0xb   :  { %1193 = vmatpush3.msra.mxu0 %v1404_v17  ;;  %v158_v34 = vand.u32 4294901760, %v157_v30  ;;  %v165_v35 = vand.u32 4294901760, %v164_v31  ;;  %v693_v55 = vsub.f32 %v587_v22, %v1413_v24 }
   0xc   :  { %34 = vbcast.lane.b32.xlu1 %v28_v28, 264  ;;  %30 = vbcast.lane.b32.xlu0 %v28_v28, 256  ;;  %v682_v37 = vand.u32 4294901760, %v681_v33  ;;  %v689_v39 = vand.u32 4294901760, %v688_v36  ;;  %v1435_v54 = vand.u32 4294901760, %v169_v46 }
   0xd   :  { %v1300_v38 = vpack.c.bf16 %v165_v35, %v158_v34  ;;  %1247 = vmatpush3.msra.mxu1 %v1413_v24  ;;  %v1450_v3 = vand.u32 4294901760, %v693_v55 }
   0xe   :  { %v1324_v40 = vpack.c.bf16 %v689_v39, %v682_v37  ;;  %v171_v2 = vsub.f32 %v169_v46, %v1435_v54 }
   0xf   :  { %1301 = vmatprep.subr.bf16.mxu0 %v1300_v38  ;;  %v695_v13 = vsub.f32 %v693_v55, %v1450_v3 }
  0x10   :  { %1325 = vmatprep.subr.bf16.mxu1 %v1324_v40  ;;  %v172_v12 = vand.u32 4294901760, %v171_v2 }
  0x11   :  { %v696_v21 = vand.u32 4294901760, %v695_v13 }
  0x7a   :  { %v24_v47 = vpop.permute.xlu1 %23  ;;  %v20_v48 = vpop.permute.xlu0 %19 }
  0x7b   :  { %vm37_vm2 = vcmp.eq.s32.totalorder %v24_v47, %v13_v45  ;;  %vm36_vm3 = vcmp.eq.s32.totalorder %v20_v48, %v13_v45 }
  0x7c   :  { %v1427_v50 = vsel %vm37_vm2, 1.0, %v1365_v49  ;;  %v1429_v51 = vsel %vm36_vm3, 1.0, %v1365_v49 }
  0x7d   :  { %v59_v52 = vsel %vm54_vm1, %v1427_v50, 0  ;;  %v56_v53 = vsel %vm54_vm1, %v1429_v51, 0 }
  0x7e   :  { %v1438_v56 = vsub.f32 %v59_v52, %v59_v52  ;;  %v35_v57 = vpop.permute.xlu1 %34  ;;  %v31_v58 = vpop.permute.xlu0 %30  ;;  %v134_v59 = vsub.f32 %v56_v53, %v56_v53 }
  0x7f   :  { %vm39_vm4 = vcmp.eq.s32.totalorder %v35_v57, %v13_v45  ;;  %vm38_vm5 = vcmp.eq.s32.totalorder %v31_v58, %v13_v45 }
  0x80   :  { %v1440_v60 = vsel %vm39_vm4, 1.0, %v1365_v49  ;;  %v1442_v61 = vsel %vm38_vm5, 1.0, %v1365_v49  ;;  %v135_v62 = vand.u32 4294901760, %v134_v59  ;;  %v145_v63 = vand.u32 4294901760, %v1438_v56 }
  0x81   :  { %v584_v0 = vsel %vm54_vm1, %v1440_v60, 0  ;;  %v581_v1 = vsel %vm54_vm1, %v1442_v61, 0 }
  0x82   :  { %v668_v4 = vsub.f32 %v584_v0, %v584_v0  ;;  %v136_v5 = vsub.f32 %v134_v59, %v135_v62  ;;  %v146_v6 = vsub.f32 %v1438_v56, %v145_v63  ;;  %v658_v7 = vsub.f32 %v581_v1, %v581_v1 }
  0x84   :  { %v137_v8 = vand.u32 4294901760, %v136_v5  ;;  %v147_v9 = vand.u32 4294901760, %v146_v6  ;;  %v659_v10 = vand.u32 4294901760, %v658_v7  ;;  %v669_v11 = vand.u32 4294901760, %v668_v4 }
  0x86   :  { %1194 = vmatprep.mubr.f32.mxu0 %v137_v8  ;;  %v660_v15 = vsub.f32 %v658_v7, %v659_v10  ;;  %v670_v18 = vsub.f32 %v668_v4, %v669_v11 }
  0x87   :  { %1195 = vmatmul.mubr.f32.vlgmr.msra.gmra.mrb[0].mxu0 %v147_v9 }
  0x88   :  { %1203 = vmatprep.mubr.msk.f32.mxu0 %vm54_vm1, %v1429_v51  ;;  %1303 = vmatpush3.bf16.msra.mxu0 %v1300_v38  ;;  %v661_v19 = vand.u32 4294901760, %v660_v15  ;;  %v671_v20 = vand.u32 4294901760, %v670_v18 }
  0x89   :  { %1201 = vmatprep.subr.mxu0 %v172_v12 }
  0x8a   :  { %1248 = vmatprep.mubr.f32.mxu1 %v661_v19 }
  0x8b   :  { %1249 = vmatmul.mubr.f32.vlgmr.msra.gmra.mrb[0].mxu1 %v671_v20 }
  0x8c   :  { %1327 = vmatpush3.bf16.msra.mxu1 %v1324_v40  ;;  %1257 = vmatprep.mubr.msk.f32.mxu1 %vm54_vm1, %v1442_v61 }
  0x8d   :  { %1202 = vmatpush3.msra.mxu0 %v172_v12  ;;  %1255 = vmatprep.subr.mxu1 %v696_v21 }
  0x8e   :  { %1305 = vmatprep.subr.bf16.mxu0 %v1304_v41 }
  0x8f   :  { %1204 = vmatmul.mubr.msk.f32.vlgmr.msra.gmra.mrb[0].mxu0 %vm54_vm1, %v1427_v50 }
  0x90   :  { %1256 = vmatpush3.msra.mxu1 %v696_v21  ;;  %1212 = vmatprep.mubr.f32.mxu0 %v134_v59 }
  0x91   :  { %1307 = vmatpush3.bf16.msra.mxu0 %v1304_v41  ;;  %1329 = vmatprep.subr.bf16.mxu1 %v1420_v42 }
  0x92   :  { %1210 = vmatprep.subr.mxu0 %v169_v46 }
  0x93   :  { %1258 = vmatmul.mubr.msk.f32.vlgmr.msra.gmra.mrb[0].mxu1 %vm54_vm1, %v1440_v60 }
  0x94   :  { %1331 = vmatpush3.bf16.msra.mxu1 %v1420_v42  ;;  %1266 = vmatprep.mubr.f32.mxu1 %v658_v7 }
  0x95   :  { %1211 = vmatpush3.msra.mxu0 %v169_v46  ;;  %1264 = vmatprep.subr.mxu1 %v693_v55 }
  0x96   :  { %1309 = vmatprep.subr.bf16.mxu0 %v1399_v14 }
  0x97   :  { %1213 = vmatmul.mubr.f32.vlgmr.msra.gmra.mrb[0].mxu0 %v1438_v56 }
  0x98   :  { %1265 = vmatpush3.msra.mxu1 %v693_v55  ;;  %1221 = vmatprep.mubr.f32.mxu0 %v135_v62 }
  0x99   :  { %1311 = vmatpush3.bf16.msra.mxu0 %v1399_v14  ;;  %1333 = vmatprep.subr.bf16.mxu1 %v1402_v16 }
  0x9a   :  { %1219 = vmatprep.subr.mxu0 %v1404_v17 }
  0x9b   :  { %1267 = vmatmul.mubr.f32.vlgmr.msra.gmra.mrb[0].mxu1 %v668_v4 }
  0x9c   :  { %1335 = vmatpush3.bf16.msra.mxu1 %v1402_v16  ;;  %1275 = vmatprep.mubr.f32.mxu1 %v659_v10 }
  0x9d   :  { %1220 = vmatpush3.msra.mxu0 %v1404_v17  ;;  %1273 = vmatprep.subr.mxu1 %v1413_v24 }
  0x9e   :  { %1313 = vmatprep.subr.bf16.mxu0 %v1422_v43 }
  0x9f   :  { %1222 = vmatmul.mubr.f32.vlgmr.msra.gmra.mrb[0].mxu0 %v145_v63 }
  0xa0   :  { %1274 = vmatpush3.msra.mxu1 %v1413_v24  ;;  %1230 = vmatprep.mubr.msk.f32.mxu0 %vm54_vm1, %v1429_v51 }
  0xa1   :  { %1315 = vmatpush3.bf16.msra.mxu0 %v1422_v43  ;;  %1337 = vmatprep.subr.bf16.mxu1 %v1424_v44 }
  0xa2   :  { %1228 = vmatprep.subr.mxu0 %v1435_v54 }
  0xa3   :  { %1276 = vmatmul.mubr.f32.vlgmr.msra.gmra.mrb[0].mxu1 %v669_v11 }
  0xa4   :  { %1339 = vmatpush3.bf16.msra.mxu1 %v1424_v44  ;;  %1284 = vmatprep.mubr.msk.f32.mxu1 %vm54_vm1, %v1442_v61 }
  0xa5   :  { %1229 = vmatpush3.msra.mxu0 %v1435_v54  ;;  %1282 = vmatprep.subr.mxu1 %v1450_v3 }
  0xa6   :  { %1317 = vmatprep.subr.bf16.mxu0 %v1399_v14 }
  0xa7   :  { %1231 = vmatmul.mubr.msk.f32.vlgmr.msra.gmra.mrb[0].mxu0 %vm54_vm1, %v1427_v50 }
  0xa8   :  { %1283 = vmatpush3.msra.mxu1 %v1450_v3  ;;  %1239 = vmatprep.mubr.msk.f32.mxu0 %vm54_vm1, %v1429_v51 }
  0xa9   :  { %1319 = vmatpush3.bf16.msra.mxu0 %v1399_v14  ;;  %1341 = vmatprep.subr.bf16.mxu1 %v1402_v16 }
  0xaa   :  { %1237 = vmatprep.subr.mxu0 %v1404_v17 }
  0xab   :  { %1285 = vmatmul.mubr.msk.f32.vlgmr.msra.gmra.mrb[0].mxu1 %vm54_vm1, %v1440_v60 }
  0xac   :  { %1343 = vmatpush3.bf16.msra.mxu1 %v1402_v16  ;;  %1293 = vmatprep.mubr.msk.f32.mxu1 %vm54_vm1, %v1442_v61 }
  0xad   :  { %1238 = vmatpush3.msra.mxu0 %v1404_v17  ;;  %1291 = vmatprep.subr.mxu1 %v1413_v24 }
  0xaf   :  { %1240 = vmatmul.mubr.msk.f32.vlgmr.msra.gmra.mrb[0].mxu0 %vm54_vm1, %v1427_v50 }
  0xb0   :  { %1292 = vmatpush3.msra.mxu1 %v1413_v24 }
  0xb3   :  { %1294 = vmatmul.mubr.msk.f32.vlgmr.msra.gmra.mrb[0].mxu1 %vm54_vm1, %v1440_v60 }
 0x182   :  { %v1241_v14 = vpop.f32.mrb[0].mxu0 }
 0x183   :  { %1105 = vst [vmem:[%s1519_s2 + $0x8] sm:$0x1] %v1241_v14  ;;  %v570_v16 = vpop.f32.mrb[1].mxu0 }
 0x184   :  { %1104 = vst [vmem:[%s1519_s2] sm:$0xff] %v570_v16 }
 0x186   :  { %v1295_v17 = vpop.f32.mrb[0].mxu1 }
 0x187   :  { %1107 = vst [vmem:[%s1519_s2 + $0x18] sm:$0x1] %v1295_v17  ;;  %v1094_v22 = vpop.f32.mrb[1].mxu1 }
 0x188   :  { %1106 = vst [vmem:[%s1519_s2 + $0x10] sm:$0xff] %v1094_v22 }

</bundles_post_ra>
